<compile_context>
chip_gen: v6e
topology: v6e:2x2x1
jax: 0.10.0
libtpu: 0.0.40
codegen_flags: <defaults>
</compile_context>

<pallas_src>
import jax
import jax.numpy as jnp
from jax.experimental import pallas as pl
from jax.experimental.pallas import tpu as pltpu

_LANE = 128
_SUBLANE = 8
_DEFAULT_TB = 8192                       # batch tile (lanes), multiple of 128
_ONEHOT_VMEM_BUDGET = 8 * 1024 * 1024    # cap for in-kernel one-hot temporaries


def _round_up(x, m):
    return ((x + m - 1) // m) * m


def mf_fused_kernel(users_ref, items_ref, pT_ref, qT_ref, out_ref):
    """Fused gather + dot-product + bias.

    users/items : (1, tb)   int32, batch on lanes
    pT          : (Kp, Up)  f32, VMEM-resident augmented user table (bias folded in)
    qT          : (Kp, Ip)  f32, VMEM-resident augmented item table
    out         : (1, tb)   f32, lane-dense
    """
    tb = out_ref.shape[1]
    up = pT_ref.shape[1]
    ip = qT_ref.shape[1]

    u_idx = users_ref[...]                                    # (1, tb)
    i_idx = items_ref[...]                                    # (1, tb)

    # One-hot gather matrices, built on the VPU (iota + compare + cast).
    u_onehot = (jax.lax.broadcasted_iota(jnp.int32, (up, tb), 0) == u_idx
                ).astype(jnp.float32)                         # (Up, tb)
    i_onehot = (jax.lax.broadcasted_iota(jnp.int32, (ip, tb), 0) == i_idx
                ).astype(jnp.float32)                         # (Ip, tb)

    # Row gather via the (otherwise idle) MXU: (Kp, Up) @ (Up, tb) -> (Kp, tb).
    pm = jnp.dot(pT_ref[...], u_onehot, preferred_element_type=jnp.float32)
    qm = jnp.dot(qT_ref[...], i_onehot, preferred_element_type=jnp.float32)

    # Elementwise product (VPU) + sublane reduce over latent+bias dims (XLU)
    # -> lane-dense (1, tb) result (dot + user_bias + item_bias).
    out_ref[...] = jnp.sum(pm * qm, axis=0, keepdims=True).astype(out_ref.dtype)


def matrix_factorization_forward(P, Q, bu_tab, bi_tab, users, items, *, tb=_DEFAULT_TB):
    """P:(U,K) Q:(I,K) bu_tab:(U,1) bi_tab:(I,1) users/items:(B,) int -> (B,) f32."""
    B = users.shape[0]
    U, K = P.shape
    I = Q.shape[0]

    # ---- fold biases into two extra latent columns -------------------------
    #   P_aug[u] = [P[u], bu[u], 1],  Q_aug[i] = [Q[i], 1, bi[i]]
    #   => sum_k P_aug[u,k] * Q_aug[i,k] = dot(P[u], Q[i]) + bu[u] + bi[i]
    P_aug = jnp.concatenate(
        [P, bu_tab.astype(P.dtype), jnp.ones((U, 1), P.dtype)], axis=1)
    Q_aug = jnp.concatenate(
        [Q, jnp.ones((I, 1), Q.dtype), bi_tab.astype(Q.dtype)], axis=1)

    Kaug = K + 2
    Kp = _round_up(Kaug, _SUBLANE)
    Up = _round_up(U, _LANE)
    Ip = _round_up(I, _LANE)

    # Tiny tables: transpose + zero-pad once, keep whole-array resident in VMEM.
    # Padding rows/cols are zero so they contribute nothing to the reduce.
    # TODO(synk): for large U/I (tables that do not fit VMEM) switch to Path B:
    # PrefetchScalarGridSpec(num_scalar_prefetch=2) with indices in SMEM, tables
    # as memory_space=pl.ANY, and a double-buffered per-row DMA gather.
    pT = jnp.pad(P_aug.T.astype(jnp.float32), ((0, Kp - Kaug), (0, Up - U)))
    qT = jnp.pad(Q_aug.T.astype(jnp.float32), ((0, Kp - Kaug), (0, Ip - I)))

    # ---- batch tile selection ----------------------------------------------
    # Dominant in-kernel VMEM term is the two one-hot temporaries: (Up+Ip)*tb*4 B.
    cap = (_ONEHOT_VMEM_BUDGET // ((Up + Ip) * 4)) // _LANE * _LANE
    tb = max(_LANE, min(_round_up(tb, _LANE), max(cap, _LANE)))

    Bp = _round_up(B, _LANE)
    if Bp <= tb:
        if Bp >= 2 * _LANE:
            tb = _round_up(Bp // 2, _LANE)   # >=2 grid steps: both v7x TCs busy
        else:
            tb = Bp                          # single 128-wide step for tiny B
    Bp = _round_up(Bp, tb)
    grid = Bp // tb

    # Pad the index vectors (cheap) up to the tile boundary; index 0 is a valid
    # row and the padded lanes are sliced off below.  Note: an out-of-range
    # index yields 0 here (all-zero one-hot), whereas torch.nn.Embedding raises.
    users_p = jnp.pad(users.astype(jnp.int32), (0, Bp - B)).reshape(1, Bp)
    items_p = jnp.pad(items.astype(jnp.int32), (0, Bp - B)).reshape(1, Bp)

    out = pl.pallas_call(
        mf_fused_kernel,
        out_shape=jax.ShapeDtypeStruct((1, Bp), jnp.float32),
        grid_spec=pltpu.PrefetchScalarGridSpec(
            num_scalar_prefetch=0,
            grid=(grid,),
            in_specs=[
                pl.BlockSpec((1, tb), lambda i: (0, i)),            # users tile
                pl.BlockSpec((1, tb), lambda i: (0, i)),            # items tile
                pl.BlockSpec(memory_space=pltpu.MemorySpace.VMEM),  # pT (resident)
                pl.BlockSpec(memory_space=pltpu.MemorySpace.VMEM),  # qT (resident)
            ],
            out_specs=pl.BlockSpec((1, tb), lambda i: (0, i)),
        ),
        compiler_params=pltpu.CompilerParams(
            dimension_semantics=("parallel",),     # megacore-shards batch on v7x
            vmem_limit_bytes=32 * 1024 * 1024,     # v5e scoped default is only 16 MiB
        ),
    )(users_p, items_p, pT, qT)

    return out.reshape(-1)[:B]   # Rm.flatten(), padding dropped


if __name__ == "__main__":
    latent_factor = 32
    user_num = 64
    item_num = 48
    batch = 16

    key = jax.random.PRNGKey(0)
    kP, kQ, kbu, kbi, ku, ki = jax.random.split(key, 6)

    # Deterministic init, mirroring torch.nn.init.normal_(mean=0, std=0.01).
    P = 0.01 * jax.random.normal(kP, (user_num, latent_factor), dtype=jnp.float32)
    Q = 0.01 * jax.random.normal(kQ, (item_num, latent_factor), dtype=jnp.float32)
    bu_tab = 0.01 * jax.random.normal(kbu, (user_num, 1), dtype=jnp.float32)
    bi_tab = 0.01 * jax.random.normal(kbi, (item_num, 1), dtype=jnp.float32)

    users = jax.random.randint(ku, (batch,), 0, user_num, dtype=jnp.int32)
    items = jax.random.randint(ki, (batch,), 0, item_num, dtype=jnp.int32)

    out = matrix_factorization_forward(P, Q, bu_tab, bi_tab, users, items)
    out = jax.block_until_ready(out)

    # Pure-JAX reference for correctness.
    Pm = jnp.take(P, users, axis=0)
    Qm = jnp.take(Q, items, axis=0)
    ref = (Pm * Qm).sum(axis=1) + jnp.take(bu_tab, users, axis=0).squeeze() \
          + jnp.take(bi_tab, items, axis=0).squeeze()
    ref = ref.reshape(-1)

    assert out.shape == (batch,)
    assert jnp.allclose(out, ref, atol=1e-6, rtol=1e-5)

    print("KERNEL_OK")
</pallas_src>

<mosaic_0001>
module attributes {stable_mosaic.version = 11 : i64} {
  func.func @mf_fused_kernel(%arg0: i32, %arg1: memref<1x128xi32, #tpu.memory_space<vmem>>, %arg2: memref<1x128xi32, #tpu.memory_space<vmem>>, %arg3: memref<40x128xf32, #tpu.memory_space<vmem>>, %arg4: memref<40x128xf32, #tpu.memory_space<vmem>>, %arg5: memref<1x128xf32, #tpu.memory_space<vmem>>) attributes {dimension_semantics = [#tpu.dimension_semantics<parallel>], iteration_bounds = array<i64: 1>, scalar_prefetch = 0 : i64, scratch_operands = 0 : i64, tpu.core_type = #tpu.core_type<tc>, window_params = [{transform_indices = @transform_0, window_bounds = array<i64: 1, 128>}, {transform_indices = @transform_1, window_bounds = array<i64: 1, 128>}, {pipeline_mode = #tpu.pipeline_mode<synchronous>, transform_indices = @transform_2, window_bounds = array<i64: 40, 128>}, {pipeline_mode = #tpu.pipeline_mode<synchronous>, transform_indices = @transform_3, window_bounds = array<i64: 40, 128>}, {transform_indices = @transform_4, window_bounds = array<i64: 1, 128>}]} {
    %c0 = arith.constant 0 : index
    %c0_0 = arith.constant 0 : index
    %0 = vector.load %arg1[%c0, %c0_0] : memref<1x128xi32, #tpu.memory_space<vmem>>, vector<1x128xi32>
    %c0_1 = arith.constant 0 : index
    %c0_2 = arith.constant 0 : index
    %1 = vector.load %arg2[%c0_1, %c0_2] : memref<1x128xi32, #tpu.memory_space<vmem>>, vector<1x128xi32>
    %2 = tpu.iota {dimensions = array<i32: 0>} : vector<128x128xi32>
    %3 = vector.broadcast %0 : vector<1x128xi32> to vector<128x128xi32>
    %4 = arith.cmpi eq, %2, %3 : vector<128x128xi32>
    %5 = arith.extui %4 : vector<128x128xi1> to vector<128x128xi32>
    %6 = arith.sitofp %5 : vector<128x128xi32> to vector<128x128xf32>
    %7 = tpu.iota {dimensions = array<i32: 0>} : vector<128x128xi32>
    %8 = vector.broadcast %1 : vector<1x128xi32> to vector<128x128xi32>
    %9 = arith.cmpi eq, %7, %8 : vector<128x128xi32>
    %10 = arith.extui %9 : vector<128x128xi1> to vector<128x128xi32>
    %11 = arith.sitofp %10 : vector<128x128xi32> to vector<128x128xf32>
    %c0_3 = arith.constant 0 : index
    %c0_4 = arith.constant 0 : index
    %12 = vector.load %arg3[%c0_3, %c0_4] : memref<40x128xf32, #tpu.memory_space<vmem>>, vector<40x128xf32>
    %cst = arith.constant dense<0.000000e+00> : vector<40x128xf32>
    %13 = tpu.matmul %12, %6, %cst {dimension_numbers = #tpu.dot_dimension_numbers<[1], [0], [0], [1], [0, 0, 1, 1], [], []>} : vector<40x128xf32>, vector<128x128xf32>, vector<40x128xf32> -> vector<40x128xf32>
    %c0_5 = arith.constant 0 : index
    %c0_6 = arith.constant 0 : index
    %14 = vector.load %arg4[%c0_5, %c0_6] : memref<40x128xf32, #tpu.memory_space<vmem>>, vector<40x128xf32>
    %cst_7 = arith.constant dense<0.000000e+00> : vector<40x128xf32>
    %15 = tpu.matmul %14, %11, %cst_7 {dimension_numbers = #tpu.dot_dimension_numbers<[1], [0], [0], [1], [0, 0, 1, 1], [], []>} : vector<40x128xf32>, vector<128x128xf32>, vector<40x128xf32> -> vector<40x128xf32>
    %16 = arith.mulf %13, %15 : vector<40x128xf32>
    %cst_8 = arith.constant dense<0.000000e+00> : vector<128xf32>
    %17 = vector.multi_reduction <add>, %16, %cst_8 [0] : vector<40x128xf32> to vector<128xf32>
    %18 = vector.shape_cast %17 : vector<128xf32> to vector<1x128xf32>
    %c0_9 = arith.constant 0 : index
    %c0_10 = arith.constant 0 : index
    %19 = vector.load %arg5[%c0_9, %c0_10] : memref<1x128xf32, #tpu.memory_space<vmem>>, vector<1x128xf32>
    tpu.vector_store %arg5[%c0_9, %c0_10], %18 {strides = array<i32>} : memref<1x128xf32, #tpu.memory_space<vmem>>, vector<1x128xf32>,
    return
  }
  func.func @transform_0(%arg0: i32) -> (i32, i32) {
    %c0_i32 = arith.constant 0 : i32
    %c0_i32_0 = arith.constant 0 : i32
    return %c0_i32, %arg0 : i32, i32
  }
  func.func @transform_1(%arg0: i32) -> (i32, i32) {
    %c0_i32 = arith.constant 0 : i32
    %c0_i32_0 = arith.constant 0 : i32
    return %c0_i32, %arg0 : i32, i32
  }
  func.func @transform_2(%arg0: i32) -> (i32, i32) {
    %c0_i32 = arith.constant 0 : i32
    %c0_i32_0 = arith.constant 0 : i32
    %c0_i32_1 = arith.constant 0 : i32
    return %c0_i32, %c0_i32_0 : i32, i32
  }
  func.func @transform_3(%arg0: i32) -> (i32, i32) {
    %c0_i32 = arith.constant 0 : i32
    %c0_i32_0 = arith.constant 0 : i32
    %c0_i32_1 = arith.constant 0 : i32
    return %c0_i32, %c0_i32_0 : i32, i32
  }
  func.func @transform_4(%arg0: i32) -> (i32, i32) {
    %c0_i32 = arith.constant 0 : i32
    %c0_i32_0 = arith.constant 0 : i32
    return %c0_i32, %arg0 : i32, i32
  }
}

</mosaic_0001>

<bundles_post_ra>
// kernel: tpu_custom_call.1
= control target key start
LH: loop header
LB: loop body
LE: loop exit
PB: predicated region body
PF: predicated region fallthrough
CT: control target
= control target key end

     0   :  { %9 = vsyncpa [#allocation3], 0  ;;  %s887_s0 = inlined_call_operand.hbm [shape: s32[1,128], index: 0, kind: input, shape index: {}]   ;;  %s888_s1 = inlined_call_operand.vmem [shape: s32[1,128], index: 1, kind: input, shape index: {}]   ;;  %s889_s2 = inlined_call_operand.hbm [shape: f32[40,128], index: 2, kind: input, shape index: {}]   ;;  %s890_s3 = inlined_call_operand.hbm [shape: f32[40,128], index: 3, kind: input, shape index: {}]   ;;  %s891_s4 = inlined_call_operand.hbm [shape: f32[1,128], index: 4, kind: output, shape index: {}]  }
   0x1   :  { %10 = vsyncpa [#allocation6], 0 }
   0x2   :  { %11 = vsyncpa [#allocation4], 0  ;;  %s699_s15 = smov [#allocation5]  }
   0x3   :  { %s29_s16 = sshll.u32 %s699_s15, 4  ;;  %s30_s16 = int_to_ptr.vmem [resolvable:$true] %s29_s16 }
   0x4   :  { %s621_s17 = scalar_lea.vmem %s30_s16, 640  ;;  %p626_p1 = scmp.lt.s32.totalorder %s30_s16, %s30_s16 }
   0x5   :  { %p622_p0 = scmp.ne.s32.totalorder %s30_s16, %s621_s17  ;;  %p627_p2 = scmp.lt.s32.totalorder %s621_s17, %s621_s17 }
   0x7   :  { %p628_p3 = por %p627_p2, %p626_p1 }
   0x9   :  { %p629_p4 = pnand %p628_p3, %p622_p0 }
   0xb   :  { %632 = shalt.err (!%p629_p4)
}
   0xc   :  { %s700_s18 = smov 128   ;;  %s701_s19 = smov 8  }
   0xd   :  { %35 = dma.hbm_to_vmem [thread:$0]  %s889_s2, 640, %s30_s16, [#allocation6], %s700_s18, %s700_s18, %s701_s19  }
   0xe   :  { %s702_s22 = smov [#allocation2]   ;;  %s703_s24 = smov [#allocation7]  }
   0xf   :  { %s18_s23 = sshll.u32 %s702_s22, 4  ;;  %s41_s25 = sshll.u32 %s703_s24, 4  ;;  %s19_s23 = int_to_ptr.vmem [resolvable:$true] %s18_s23  ;;  %s42_s25 = int_to_ptr.vmem [resolvable:$true] %s41_s25 }
  0x10   :  { %s641_s26 = scalar_lea.vmem %s19_s23, 16  ;;  %s645_s27 = scalar_lea.vmem %s19_s23, 32 }
  0x11   :  { %p642_p5 = scmp.ne.s32.totalorder %s19_s23, %s641_s26  ;;  %p646_p6 = scmp.lt.s32.totalorder %s19_s23, %s19_s23 }
  0x12   :  { %p647_p7 = scmp.lt.s32.totalorder %s645_s27, %s641_s26 }
  0x14   :  { %p648_p8 = por %p647_p7, %p646_p6 }
  0x16   :  { %p649_p9 = pnand %p648_p8, %p642_p5 }
  0x18   :  { %652 = shalt.err (!%p649_p9)
}
  0x19   :  { %21 = dma.hbm_to_vmem [thread:$0]  %s887_s0, 16, %s19_s23, [#allocation3]  }
  0x1a   :  { %s661_s30 = scalar_lea.vmem %s42_s25, 640  ;;  %p666_p11 = scmp.lt.s32.totalorder %s42_s25, %s42_s25 }
  0x1b   :  { %p662_p10 = scmp.ne.s32.totalorder %s42_s25, %s661_s30  ;;  %p667_p12 = scmp.lt.s32.totalorder %s661_s30, %s661_s30 }
  0x1d   :  { %p668_p13 = por %p667_p12, %p666_p11 }
  0x1f   :  { %p669_p0 = pnand %p668_p13, %p662_p10 }
  0x21   :  { %672 = shalt.err (!%p669_p0)
}
  0x22   :  { %47 = dma.hbm_to_vmem [thread:$0]  %s890_s3, 640, %s42_s25, [#allocation6], %s700_s18, %s700_s18, %s701_s19  }
  0x23   :  { %693 = dma.done.wait [#allocation3], 16  }
  0x24   :  { %694 = vsyncadd [#allocation3], 4294967280 }
  0x25   :  { %695 = dma.done.wait [#allocation6], 1280  }
  0x26   :  { %696 = vsyncadd [#allocation6], 4294966016  ;;  %v59_v0 = vlaneseq  ;;  %v704_v1 = vmov 0.0   ;;  %vm705_vm0 = vmmov 0   ;;  %v753_v6 = vld [vmem:[#allocation2] ss:$0 sm:$0xff] }
  0x27   :  { %510 = vmatprep.subr.mxu0 %v704_v1  ;;  %557 = vmatprep.subr.mxu1 %v704_v1  ;;  %v758_v7 = vld [vmem:[%s888_s1] ss:$0 sm:$0xff]  ;;  %v706_v9 = vmov 1.0   ;;  %v180_v21 = vld [vmem:[#allocation5] sm:$0xff]  ;;  %v275_v22 = vld [vmem:[#allocation7] sm:$0xff]  ;;  %s707_s1 = smov [#allocation8]  }
  0x28   :  { %v744_v2 = vshrl.u32 %v59_v0, 7  ;;  %542 = vmatprep.mubr.msk.f32.mxu0 %vm705_vm0, %v704_v1  ;;  %589 = vmatprep.mubr.msk.f32.mxu1 %vm705_vm0, %v704_v1  ;;  %v181_v23 = vld [vmem:[#allocation5 + $0x8] sm:$0xff]  ;;  %v276_v24 = vld [vmem:[#allocation7 + $0x8] sm:$0xff]  ;;  %v277_v26 = vld [vmem:[#allocation7 + $0x10] sm:$0xff]  ;;  %s392_s6 = sshll.u32 %s707_s1, 4  ;;  %s393_s6 = int_to_ptr.vmem [resolvable:$true] %s392_s6 }
  0x29   :  { %v182_v25 = vld [vmem:[#allocation5 + $0x10] sm:$0xff]  ;;  %v183_v27 = vld [vmem:[#allocation5 + $0x18] sm:$0xff]  ;;  %v278_v28 = vld [vmem:[#allocation7 + $0x18] sm:$0xff]  ;;  %s673_s7 = scalar_lea.vmem %s393_s6, 16  ;;  %s677_s8 = scalar_lea.vmem %s393_s6, 32 }
  0x2a   :  { %v75_v3 = vadd.s32 120, %v744_v2  ;;  %v74_v4 = vadd.s32 112, %v744_v2  ;;  %v73_v5 = vadd.s32 104, %v744_v2  ;;  %v72_v8 = vadd.s32 96, %v744_v2  ;;  %v184_v29 = vld [vmem:[#allocation5 + $0x20] sm:$0xff]  ;;  %v279_v30 = vld [vmem:[#allocation7 + $0x20] sm:$0xff]  ;;  %p674_p1 = scmp.ne.s32.totalorder %s393_s6, %s673_s7  ;;  %p678_p2 = scmp.lt.s32.totalorder %s393_s6, %s393_s6 }
  0x2b   :  { %v71_v10 = vadd.s32 88, %v744_v2  ;;  %v70_v11 = vadd.s32 80, %v744_v2  ;;  %v69_v12 = vadd.s32 72, %v744_v2  ;;  %v68_v13 = vadd.s32 64, %v744_v2  ;;  %p679_p3 = scmp.lt.s32.totalorder %s677_s8, %s673_s7 }
  0x2c   :  { %vm95_vm1 = vcmp.eq.s32.totalorder %v75_v3, %v753_v6  ;;  %vm147_vm2 = vcmp.eq.s32.totalorder %v75_v3, %v758_v7  ;;  %vm94_vm3 = vcmp.eq.s32.totalorder %v74_v4, %v753_v6  ;;  %vm146_vm4 = vcmp.eq.s32.totalorder %v74_v4, %v758_v7 }
  0x2d   :  { %511 = vmatpush3.msk.msra.mxu0 %vm95_vm1, %v706_v9  ;;  %558 = vmatpush3.msk.msra.mxu1 %vm147_vm2, %v706_v9  ;;  %vm93_vm5 = vcmp.eq.s32.totalorder %v73_v5, %v753_v6  ;;  %vm145_vm6 = vcmp.eq.s32.totalorder %v73_v5, %v758_v7  ;;  %vm92_vm7 = vcmp.eq.s32.totalorder %v72_v8, %v753_v6  ;;  %v67_v14 = vadd.s32 56, %v744_v2  ;;  %p680_p4 = por %p679_p3, %p678_p2 }
  0x2e   :  { %512 = vmatprep.subr.mxu0 %v704_v1  ;;  %559 = vmatprep.subr.mxu1 %v704_v1  ;;  %vm144_vm8 = vcmp.eq.s32.totalorder %v72_v8, %v758_v7  ;;  %vm91_vm9 = vcmp.eq.s32.totalorder %v71_v10, %v753_v6  ;;  %vm143_vm10 = vcmp.eq.s32.totalorder %v71_v10, %v758_v7  ;;  %v66_v15 = vadd.s32 48, %v744_v2 }
  0x2f   :  { %513 = vmatpush3.msk.msra.mxu0 %vm94_vm3, %v706_v9  ;;  %560 = vmatpush3.msk.msra.mxu1 %vm146_vm4, %v706_v9  ;;  %vm90_vm11 = vcmp.eq.s32.totalorder %v70_v11, %v753_v6  ;;  %vm142_vm12 = vcmp.eq.s32.totalorder %v70_v11, %v758_v7  ;;  %vm89_vm13 = vcmp.eq.s32.totalorder %v69_v12, %v753_v6  ;;  %v65_v16 = vadd.s32 40, %v744_v2  ;;  %p681_p5 = pnand %p680_p4, %p674_p1 }
  0x30   :  { %514 = vmatprep.subr.mxu0 %v704_v1  ;;  %561 = vmatprep.subr.mxu1 %v704_v1  ;;  %vm141_vm14 = vcmp.eq.s32.totalorder %v69_v12, %v758_v7  ;;  %vm88_vm15 = vcmp.eq.s32.totalorder %v68_v13, %v753_v6  ;;  %vm140_vm1 = vcmp.eq.s32.totalorder %v68_v13, %v758_v7  ;;  %v64_v17 = vadd.s32 32, %v744_v2 }
  0x31   :  { %515 = vmatpush3.msk.msra.mxu0 %vm93_vm5, %v706_v9  ;;  %562 = vmatpush3.msk.msra.mxu1 %vm145_vm6, %v706_v9  ;;  %vm87_vm2 = vcmp.eq.s32.totalorder %v67_v14, %v753_v6  ;;  %vm139_vm3 = vcmp.eq.s32.totalorder %v67_v14, %v758_v7  ;;  %vm86_vm4 = vcmp.eq.s32.totalorder %v66_v15, %v753_v6  ;;  %v63_v18 = vadd.s32 24, %v744_v2 }
  0x32   :  { %516 = vmatprep.subr.mxu0 %v704_v1  ;;  %563 = vmatprep.subr.mxu1 %v704_v1  ;;  %vm138_vm5 = vcmp.eq.s32.totalorder %v66_v15, %v758_v7  ;;  %vm85_vm6 = vcmp.eq.s32.totalorder %v65_v16, %v753_v6  ;;  %v62_v19 = vadd.s32 16, %v744_v2  ;;  %v61_v20 = vadd.s32 8, %v744_v2 }
  0x33   :  { %517 = vmatpush3.msk.msra.mxu0 %vm92_vm7, %v706_v9  ;;  %564 = vmatpush3.msk.msra.mxu1 %vm144_vm8, %v706_v9  ;;  %vm137_vm7 = vcmp.eq.s32.totalorder %v65_v16, %v758_v7  ;;  %vm84_vm8 = vcmp.eq.s32.totalorder %v64_v17, %v753_v6 }
  0x34   :  { %518 = vmatprep.subr.mxu0 %v704_v1  ;;  %565 = vmatprep.subr.mxu1 %v704_v1 }
  0x35   :  { %519 = vmatpush3.msk.msra.mxu0 %vm91_vm9, %v706_v9  ;;  %566 = vmatpush3.msk.msra.mxu1 %vm143_vm10, %v706_v9  ;;  %vm136_vm9 = vcmp.eq.s32.totalorder %v64_v17, %v758_v7  ;;  %vm83_vm10 = vcmp.eq.s32.totalorder %v63_v18, %v753_v6 }
  0x36   :  { %520 = vmatprep.subr.mxu0 %v704_v1  ;;  %567 = vmatprep.subr.mxu1 %v704_v1 }
  0x37   :  { %521 = vmatpush3.msk.msra.mxu0 %vm90_vm11, %v706_v9  ;;  %568 = vmatpush3.msk.msra.mxu1 %vm142_vm12, %v706_v9  ;;  %vm135_vm11 = vcmp.eq.s32.totalorder %v63_v18, %v758_v7  ;;  %vm82_vm12 = vcmp.eq.s32.totalorder %v62_v19, %v753_v6 }
  0x38   :  { %522 = vmatprep.subr.mxu0 %v704_v1  ;;  %569 = vmatprep.subr.mxu1 %v704_v1 }
  0x39   :  { %523 = vmatpush3.msk.msra.mxu0 %vm89_vm13, %v706_v9  ;;  %570 = vmatpush3.msk.msra.mxu1 %vm141_vm14, %v706_v9  ;;  %vm134_vm13 = vcmp.eq.s32.totalorder %v62_v19, %v758_v7  ;;  %vm81_vm14 = vcmp.eq.s32.totalorder %v61_v20, %v753_v6 }
  0x3a   :  { %524 = vmatprep.subr.mxu0 %v704_v1  ;;  %571 = vmatprep.subr.mxu1 %v704_v1 }
  0x3b   :  { %525 = vmatpush3.msk.msra.mxu0 %vm88_vm15, %v706_v9  ;;  %572 = vmatpush3.msk.msra.mxu1 %vm140_vm1, %v706_v9  ;;  %vm133_vm15 = vcmp.eq.s32.totalorder %v61_v20, %v758_v7  ;;  %vm80_vm1 = vcmp.eq.s32.totalorder %v744_v2, %v753_v6 }
  0x3c   :  { %526 = vmatprep.subr.mxu0 %v704_v1  ;;  %573 = vmatprep.subr.mxu1 %v704_v1 }
  0x3d   :  { %527 = vmatpush3.msk.msra.mxu0 %vm87_vm2, %v706_v9  ;;  %574 = vmatpush3.msk.msra.mxu1 %vm139_vm3, %v706_v9  ;;  %vm132_vm2 = vcmp.eq.s32.totalorder %v744_v2, %v758_v7 }
  0x3e   :  { %528 = vmatprep.subr.mxu0 %v704_v1  ;;  %575 = vmatprep.subr.mxu1 %v704_v1 }
  0x3f   :  { %529 = vmatpush3.msk.msra.mxu0 %vm86_vm4, %v706_v9  ;;  %576 = vmatpush3.msk.msra.mxu1 %vm138_vm5, %v706_v9 }
  0x40   :  { %530 = vmatprep.subr.mxu0 %v704_v1  ;;  %577 = vmatprep.subr.mxu1 %v704_v1 }
  0x41   :  { %531 = vmatpush3.msk.msra.mxu0 %vm85_vm6, %v706_v9  ;;  %578 = vmatpush3.msk.msra.mxu1 %vm137_vm7, %v706_v9 }
  0x42   :  { %532 = vmatprep.subr.mxu0 %v704_v1  ;;  %579 = vmatprep.subr.mxu1 %v704_v1 }
  0x43   :  { %533 = vmatpush3.msk.msra.mxu0 %vm84_vm8, %v706_v9  ;;  %580 = vmatpush3.msk.msra.mxu1 %vm136_vm9, %v706_v9 }
  0x44   :  { %534 = vmatprep.subr.mxu0 %v704_v1  ;;  %581 = vmatprep.subr.mxu1 %v704_v1 }
  0x45   :  { %535 = vmatpush3.msk.msra.mxu0 %vm83_vm10, %v706_v9  ;;  %582 = vmatpush3.msk.msra.mxu1 %vm135_vm11, %v706_v9 }
  0x46   :  { %536 = vmatprep.subr.mxu0 %v704_v1  ;;  %583 = vmatprep.subr.mxu1 %v704_v1 }
  0x47   :  { %537 = vmatpush3.msk.msra.mxu0 %vm82_vm12, %v706_v9  ;;  %584 = vmatpush3.msk.msra.mxu1 %vm134_vm13, %v706_v9 }
  0x48   :  { %538 = vmatprep.subr.mxu0 %v704_v1  ;;  %585 = vmatprep.subr.mxu1 %v704_v1 }
  0x49   :  { %539 = vmatpush3.msk.msra.mxu0 %vm81_vm14, %v706_v9  ;;  %586 = vmatpush3.msk.msra.mxu1 %vm133_vm15, %v706_v9 }
  0x4a   :  { %540 = vmatprep.subr.mxu0 %v704_v1  ;;  %587 = vmatprep.subr.mxu1 %v704_v1 }
  0x4b   :  { %541 = vmatpush3.msk.msra.mxu0 %vm80_vm1, %v706_v9  ;;  %588 = vmatpush3.msk.msra.mxu1 %vm132_vm2, %v706_v9 }
  0x4c   :  { %543 = vmatmul.mubr.f32.vlgmr.msra.gmra.mxu0 %v180_v21  ;;  %590 = vmatmul.mubr.f32.vlgmr.msra.gmra.mxu1 %v275_v22 }
  0x4d   :  { %545 = vmatprep.mubr.msk.f32.mxu0 %vm705_vm0, %v704_v1  ;;  %592 = vmatprep.mubr.msk.f32.mxu1 %vm705_vm0, %v704_v1 }
  0x50   :  { %546 = vmatmul.mubr.f32.gmra.mxu0 %v181_v23  ;;  %593 = vmatmul.mubr.f32.gmra.mxu1 %v276_v24 }
  0x51   :  { %548 = vmatprep.mubr.msk.f32.mxu0 %vm705_vm0, %v704_v1  ;;  %595 = vmatprep.mubr.msk.f32.mxu1 %vm705_vm0, %v704_v1 }
  0x54   :  { %549 = vmatmul.mubr.f32.gmra.mxu0 %v182_v25  ;;  %596 = vmatmul.mubr.f32.gmra.mxu1 %v277_v26 }
  0x55   :  { %551 = vmatprep.mubr.msk.f32.mxu0 %vm705_vm0, %v704_v1  ;;  %598 = vmatprep.mubr.msk.f32.mxu1 %vm705_vm0, %v704_v1 }
  0x58   :  { %552 = vmatmul.mubr.f32.gmra.mxu0 %v183_v27  ;;  %599 = vmatmul.mubr.f32.gmra.mxu1 %v278_v28 }
  0x59   :  { %554 = vmatprep.mubr.msk.f32.mxu0 %vm705_vm0, %v704_v1  ;;  %601 = vmatprep.mubr.msk.f32.mxu1 %vm705_vm0, %v704_v1 }
  0x5c   :  { %555 = vmatmul.mubr.f32.gmra.mxu0 %v184_v29  ;;  %602 = vmatmul.mubr.f32.gmra.mxu1 %v279_v30 }
 0x10c   :  { %v251_v31 = vpop.f32.mrf.mxu0  ;;  %v346_v32 = vpop.f32.mrf.mxu1 }
 0x10d   :  { %v370_v44 = vmul.f32 %v346_v32, %v251_v31 }
 0x10e   :  { %v544_v33 = vpop.f32.mrf.mxu0  ;;  %v591_v34 = vpop.f32.mrf.mxu1 }
 0x110   :  { %v256_v35 = vpop.f32.mrf.mxu0  ;;  %v351_v36 = vpop.f32.mrf.mxu1 }
 0x111   :  { %v371_v41 = vmul.f32 %v351_v36, %v256_v35 }
 0x112   :  { %v547_v37 = vpop.f32.mrf.mxu0  ;;  %v594_v38 = vpop.f32.mrf.mxu1 }
 0x113   :  { %v375_v48 = vadd.f32 %v371_v41, %v370_v44 }
 0x114   :  { %v261_v39 = vpop.f32.mrf.mxu0  ;;  %v356_v40 = vpop.f32.mrf.mxu1 }
 0x115   :  { %v372_v45 = vmul.f32 %v356_v40, %v261_v39 }
 0x116   :  { %v550_v42 = vpop.f32.mrf.mxu0  ;;  %v597_v43 = vpop.f32.mrf.mxu1 }
 0x117   :  { %v376_v52 = vadd.f32 %v375_v48, %v372_v45 }
 0x118   :  { %v266_v46 = vpop.f32.mrf.mxu0  ;;  %v361_v47 = vpop.f32.mrf.mxu1 }
 0x119   :  { %v373_v49 = vmul.f32 %v361_v47, %v266_v46 }
 0x11a   :  { %v553_v50 = vpop.f32.mrf.mxu0  ;;  %v600_v51 = vpop.f32.mrf.mxu1 }
 0x11b   :  { %v377_v55 = vadd.f32 %v376_v52, %v373_v49 }
 0x11c   :  { %v271_v53 = vpop.f32.mrf.mxu0  ;;  %v366_v54 = vpop.f32.mrf.mxu1 }
 0x11d   :  { %v374_v56 = vmul.f32 %v366_v54, %v271_v53 }
 0x11e   :  { %v556_v57 = vpop.f32.mrf.mxu0  ;;  %v603_v58 = vpop.f32.mrf.mxu1 }
 0x11f   :  { %v378_v59 = vadd.f32 %v377_v55, %v374_v56 }
 0x121   :  { %v379_v60 = vrot.slane %v378_v59, 4 }
 0x123   :  { %v380_v61 = vadd.f32 %v379_v60, %v378_v59 }
 0x125   :  { %v381_v62 = vrot.slane %v380_v61, 2 }
 0x127   :  { %v382_v63 = vadd.f32 %v381_v62, %v380_v61 }
 0x129   :  { %v383_v0 = vrot.slane %v382_v63, 1 }
 0x12b   :  { %v384_v1 = vadd.f32 %v383_v0, %v382_v63 }
 0x12d   :  { %385 = vst [vmem:[#allocation8] sm:$0x1] %v384_v1 }
 0x12e   :  { %684 = shalt.err (!%p681_p5)
}
 0x12f   :  { %395 = dma.vmem_to_hbm [thread:$0]  %s393_s6, 16, %s891_s4, [#allocation4]  }
 0x130   :  { %697 = dma.done.wait [#allocation4], 16  }
 0x131   :  { %698 = vsyncadd [#allocation4], 4294967280 }
 0x132   :  { %399 = vsyncpa [#allocation3], 1 }
 0x133   :  { %400 = vsyncpa [#allocation6], 1 }
 0x134   :  { %401 = vsyncpa [#allocation4], 1 }

</bundles_post_ra>
